<compile_context>
chip_gen: v5e
topology: v5e:2x2
jax: 0.10.0
libtpu: 0.0.40
codegen_flags: <defaults>
</compile_context>

<pallas_src>
import math

import jax
import jax.numpy as jnp
from jax.experimental import pallas as pl
from jax.experimental.pallas import tpu as pltpu

K = 3          # kernel size of every conv layer
PAD = 3        # padding of every conv layer (padding == kernel_size)
CHANNELS = (1, 8, 16, 32, 64)
N_LAYERS = 4


def _encoder_kernel(x_ref, masks_ref, w1_ref, b1_ref, w2_ref, b2_ref,
                    w3_ref, b3_ref, w4_ref, b4_ref, out_ref):
    """One grid step: TILE_N batch elements folded into the lane axis."""
    x = x_ref[0]                                 # (1, W + 4*(K-1))

    # ---- layer 1: Conv1d(1 -> 8).  Contraction dim is 1, so keep it on the
    # VPU as K broadcast multiply-adds of shifted rows (a contraction-1 MXU
    # matmul would waste a full MXU pass).
    v = x.shape[-1] - (K - 1)
    w1 = w1_ref[...]                             # (8, K)
    acc = w1[:, 0:1] * x[:, 0:v]
    for k in range(1, K):
        acc = acc + w1[:, k:k + 1] * x[:, k:k + v]
    y = jnp.maximum(acc + b1_ref[...], 0.0) * masks_ref[0:1, :v]

    # ---- layers 2..4: one im2col MXU matmul each (taps folded into the
    # contraction dimension).
    for i, (w_ref, b_ref) in enumerate(
            ((w2_ref, b2_ref), (w3_ref, b3_ref), (w4_ref, b4_ref)), start=1):
        v = y.shape[-1] - (K - 1)
        rhs = jnp.concatenate([y[:, k:k + v] for k in range(K)], axis=0)
        acc = jnp.dot(w_ref[...], rhs, preferred_element_type=jnp.float32)
        y = jnp.maximum(acc + b_ref[...], 0.0) * masks_ref[i:i + 1, :v]

    out_ref[0] = y.astype(out_ref.dtype)


def init_params(key):
    """Deterministic synthetic params; shapes follow nn.Conv1d(Cin, Cout, 3)."""
    params = []
    for i in range(N_LAYERS):
        c_in, c_out = CHANNELS[i], CHANNELS[i + 1]
        key, kw, kb = jax.random.split(key, 3)
        fan_in = c_in * K
        bound = 1.0 / (fan_in ** 0.5)            # PyTorch default uniform bound
        w = jax.random.uniform(kw, (c_out, c_in, K), jnp.float32, -bound, bound)
        b = jax.random.uniform(kb, (c_out,), jnp.float32, -bound, bound)
        params.append((w, b))
    return params


def cnn_encoder(x, params, *, tile_n=8):
    """x: (N, 1, L) float32 -> (N, 64, L + 16) float32."""
    N, c_in, L0 = x.shape
    assert c_in == 1
    L4 = L0 + 4 * N_LAYERS

    # ---- geometry: one lane segment of S columns per batch element.  Layer i's
    # input data sits at per-segment offset (N_LAYERS - i + 1)*PAD, shrinking by
    # PAD per layer, so each conv output lands exactly where the next layer
    # expects it using only static forward slices.
    s_min = L0 + 4 * (N_LAYERS - 1) + 2 * PAD        # widest window = L0 + 18
    lane_mult = 128 // math.gcd(tile_n, 128)         # make W a multiple of 128
    S = ((s_min + lane_mult - 1) // lane_mult) * lane_mult
    W = tile_n * S                                   # lane-dense output width
    extra = N_LAYERS * (K - 1)                       # global tail eaten by shifts
    off0 = N_LAYERS * PAD                            # layer-1 data offset (=12)

    grid = (N + tile_n - 1) // tile_n
    n_pad = grid * tile_n

    # ---- pack input: (N,1,L0) -> (grid, 1, W + extra), one segment per element
    x_p = jnp.pad(x, ((0, n_pad - N), (0, 0), (off0, S - off0 - L0)))
    x_packed = (x_p.reshape(grid, tile_n, 1, S)
                   .transpose(0, 2, 1, 3)
                   .reshape(grid, 1, W))
    x_packed = jnp.pad(x_packed, ((0, 0), (0, 0), (0, extra)))

    # ---- per-layer 0/1 masks: zero everything outside each segment's valid
    # output span (this realises the conv zero-padding between batch elements,
    # so the kernel never zero-fills anything).
    mask_w = W + (N_LAYERS - 1) * (K - 1)
    col = jnp.arange(mask_w, dtype=jnp.int32) % S
    rows = []
    for i in range(1, N_LAYERS + 1):
        off_i = (N_LAYERS - i) * PAD                 # 9, 6, 3, 0
        len_i = L0 + 4 * i
        rows.append(((col >= off_i) & (col < off_i + len_i)).astype(jnp.float32))
    masks = jnp.stack(rows, axis=0)                  # (4, W + 6)

    # ---- weights: layer 1 squeezed to (8, K); layers 2..4 folded to (Cout, K*Cin)
    # matching the im2col row order (k-major, then cin).
    def fold(w):                                     # (Cout, Cin, K) -> (Cout, K*Cin)
        co, ci, k = w.shape
        return jnp.transpose(w, (0, 2, 1)).reshape(co, k * ci)

    (w1, b1), (w2, b2), (w3, b3), (w4, b4) = params
    flat = [w1[:, 0, :], b1[:, None],
            fold(w2),    b2[:, None],
            fold(w3),    b3[:, None],
            fold(w4),    b4[:, None]]

    def const_spec(a):
        zeros = (0,) * a.ndim
        return pl.BlockSpec(a.shape, lambda g, z=zeros: z)

    in_specs = [pl.BlockSpec((1, 1, W + extra), lambda g: (g, 0, 0)),
                const_spec(masks)]
    in_specs += [const_spec(a) for a in flat]

    flops = 2 * K * sum(CHANNELS[i] * CHANNELS[i + 1] * (L0 + 4 * (i + 1))
                        for i in range(N_LAYERS)) * n_pad
    bytes_accessed = 4 * (x_packed.size + grid * CHANNELS[-1] * W
                          + masks.size + sum(a.size for a in flat))

    out_full = pl.pallas_call(
        _encoder_kernel,
        out_shape=jax.ShapeDtypeStruct((grid, CHANNELS[-1], W), jnp.float32),
        grid_spec=pltpu.PrefetchScalarGridSpec(
            num_scalar_prefetch=0,
            grid=(grid,),
            in_specs=in_specs,
            out_specs=pl.BlockSpec((1, CHANNELS[-1], W), lambda g: (g, 0, 0)),
        ),
        compiler_params=pltpu.CompilerParams(
            dimension_semantics=("parallel",)),
        cost_estimate=pl.CostEstimate(flops=flops, transcendentals=0,
                                      bytes_accessed=bytes_accessed),
    )(x_packed, masks, *flat)

    # ---- unpack: (grid, 64, W) -> (N, 64, L4)
    out = out_full.reshape(grid, CHANNELS[-1], tile_n, S)[:, :, :, :L4]
    out = out.transpose(0, 2, 1, 3).reshape(n_pad, CHANNELS[-1], L4)
    return out[:N]


def cnn_encoder_ref(x, params):
    """Pure-JAX reference (lax conv) for correctness checking."""
    y = x
    for w, b in params:
        y = jax.lax.conv_general_dilated(
            y, w, window_strides=(1,), padding=[(PAD, PAD)],
            dimension_numbers=("NCH", "OIH", "NCH"))
        y = jnp.maximum(y + b[None, :, None], 0.0)
    return y


if __name__ == "__main__":
    key = jax.random.PRNGKey(0)
    key, kx = jax.random.split(key)

    N, L = 10, 16                      # N deliberately not a multiple of tile_n
    x = jax.random.normal(kx, (N, 1, L), jnp.float32)
    params = init_params(key)

    out = cnn_encoder(x, params, tile_n=8)
    out = jax.block_until_ready(out)

    ref = cnn_encoder_ref(x, params)
    assert out.shape == (N, 64, L + 16), out.shape
    assert jnp.allclose(out, ref, atol=2e-4, rtol=2e-4), \
        float(jnp.max(jnp.abs(out - ref)))

    print("KERNEL_OK")
</pallas_src>

<mosaic_0001>
module attributes {stable_mosaic.version = 11 : i64} {
  func.func @_encoder_kernel(%arg0: i32, %arg1: memref<1x1x392xf32, #tpu.memory_space<vmem>>, %arg2: memref<4x390xf32, #tpu.memory_space<vmem>>, %arg3: memref<8x3xf32, #tpu.memory_space<vmem>>, %arg4: memref<8x1xf32, #tpu.memory_space<vmem>>, %arg5: memref<16x24xf32, #tpu.memory_space<vmem>>, %arg6: memref<16x1xf32, #tpu.memory_space<vmem>>, %arg7: memref<32x48xf32, #tpu.memory_space<vmem>>, %arg8: memref<32x1xf32, #tpu.memory_space<vmem>>, %arg9: memref<64x96xf32, #tpu.memory_space<vmem>>, %arg10: memref<64x1xf32, #tpu.memory_space<vmem>>, %arg11: memref<1x64x384xf32, #tpu.memory_space<vmem>>) attributes {dimension_semantics = [#tpu.dimension_semantics<parallel>], iteration_bounds = array<i64: 2>, scalar_prefetch = 0 : i64, scratch_operands = 0 : i64, tpu.core_type = #tpu.core_type<tc>, window_params = [{transform_indices = @transform_0, window_bounds = array<i64: 1, 1, 392>}, {pipeline_mode = #tpu.pipeline_mode<synchronous>, transform_indices = @transform_1, window_bounds = array<i64: 4, 390>}, {pipeline_mode = #tpu.pipeline_mode<synchronous>, transform_indices = @transform_2, window_bounds = array<i64: 8, 3>}, {pipeline_mode = #tpu.pipeline_mode<synchronous>, transform_indices = @transform_3, window_bounds = array<i64: 8, 1>}, {pipeline_mode = #tpu.pipeline_mode<synchronous>, transform_indices = @transform_4, window_bounds = array<i64: 16, 24>}, {pipeline_mode = #tpu.pipeline_mode<synchronous>, transform_indices = @transform_5, window_bounds = array<i64: 16, 1>}, {pipeline_mode = #tpu.pipeline_mode<synchronous>, transform_indices = @transform_6, window_bounds = array<i64: 32, 48>}, {pipeline_mode = #tpu.pipeline_mode<synchronous>, transform_indices = @transform_7, window_bounds = array<i64: 32, 1>}, {pipeline_mode = #tpu.pipeline_mode<synchronous>, transform_indices = @transform_8, window_bounds = array<i64: 64, 96>}, {pipeline_mode = #tpu.pipeline_mode<synchronous>, transform_indices = @transform_9, window_bounds = array<i64: 64, 1>}, {transform_indices = @transform_10, window_bounds = array<i64: 1, 64, 384>}]} {
    %c0 = arith.constant 0 : index
    %c0_0 = arith.constant 0 : index
    %c0_1 = arith.constant 0 : index
    %0 = vector.load %arg1[%c0, %c0_0, %c0_1] : memref<1x1x392xf32, #tpu.memory_space<vmem>>, vector<1x1x392xf32>
    %1 = vector.shape_cast %0 : vector<1x1x392xf32> to vector<1x392xf32>
    %c0_2 = arith.constant 0 : index
    %c0_3 = arith.constant 0 : index
    %2 = vector.load %arg3[%c0_2, %c0_3] : memref<8x3xf32, #tpu.memory_space<vmem>>, vector<8x3xf32>
    %3 = vector.extract_strided_slice %2 {offsets = [0, 0], sizes = [8, 1], strides = [1, 1]} : vector<8x3xf32> to vector<8x1xf32>
    %4 = vector.extract_strided_slice %1 {offsets = [0, 0], sizes = [1, 390], strides = [1, 1]} : vector<1x392xf32> to vector<1x390xf32>
    %5 = vector.broadcast %3 : vector<8x1xf32> to vector<8x390xf32>
    %6 = vector.broadcast %4 : vector<1x390xf32> to vector<8x390xf32>
    %7 = arith.mulf %5, %6 : vector<8x390xf32>
    %8 = vector.extract_strided_slice %2 {offsets = [0, 1], sizes = [8, 1], strides = [1, 1]} : vector<8x3xf32> to vector<8x1xf32>
    %9 = vector.extract_strided_slice %1 {offsets = [0, 1], sizes = [1, 390], strides = [1, 1]} : vector<1x392xf32> to vector<1x390xf32>
    %10 = vector.broadcast %8 : vector<8x1xf32> to vector<8x390xf32>
    %11 = vector.broadcast %9 : vector<1x390xf32> to vector<8x390xf32>
    %12 = arith.mulf %10, %11 : vector<8x390xf32>
    %13 = arith.addf %7, %12 : vector<8x390xf32>
    %14 = vector.extract_strided_slice %2 {offsets = [0, 2], sizes = [8, 1], strides = [1, 1]} : vector<8x3xf32> to vector<8x1xf32>
    %15 = vector.extract_strided_slice %1 {offsets = [0, 2], sizes = [1, 390], strides = [1, 1]} : vector<1x392xf32> to vector<1x390xf32>
    %16 = vector.broadcast %14 : vector<8x1xf32> to vector<8x390xf32>
    %17 = vector.broadcast %15 : vector<1x390xf32> to vector<8x390xf32>
    %18 = arith.mulf %16, %17 : vector<8x390xf32>
    %19 = arith.addf %13, %18 : vector<8x390xf32>
    %c0_4 = arith.constant 0 : index
    %c0_5 = arith.constant 0 : index
    %20 = vector.load %arg4[%c0_4, %c0_5] : memref<8x1xf32, #tpu.memory_space<vmem>>, vector<8x1xf32>
    %21 = vector.broadcast %20 : vector<8x1xf32> to vector<8x390xf32>
    %22 = arith.addf %19, %21 : vector<8x390xf32>
    %cst = arith.constant 0.000000e+00 : f32
    %23 = vector.broadcast %cst : f32 to vector<8x390xf32>
    %24 = arith.maximumf %22, %23 : vector<8x390xf32>
    %c0_6 = arith.constant 0 : index
    %c0_7 = arith.constant 0 : index
    %25 = vector.load %arg2[%c0_6, %c0_7] : memref<4x390xf32, #tpu.memory_space<vmem>>, vector<1x390xf32>
    %26 = vector.broadcast %25 : vector<1x390xf32> to vector<8x390xf32>
    %27 = arith.mulf %24, %26 : vector<8x390xf32>
    %28 = vector.extract_strided_slice %27 {offsets = [0, 0], sizes = [8, 388], strides = [1, 1]} : vector<8x390xf32> to vector<8x388xf32>
    %29 = vector.extract_strided_slice %27 {offsets = [0, 1], sizes = [8, 388], strides = [1, 1]} : vector<8x390xf32> to vector<8x388xf32>
    %30 = vector.extract_strided_slice %27 {offsets = [0, 2], sizes = [8, 388], strides = [1, 1]} : vector<8x390xf32> to vector<8x388xf32>
    %31 = tpu.concatenate %28, %29, %30 in 0 : vector<8x388xf32>, vector<8x388xf32>, vector<8x388xf32> -> vector<24x388xf32>
    %c0_8 = arith.constant 0 : index
    %c0_9 = arith.constant 0 : index
    %32 = vector.load %arg5[%c0_8, %c0_9] : memref<16x24xf32, #tpu.memory_space<vmem>>, vector<16x24xf32>
    %cst_10 = arith.constant dense<0.000000e+00> : vector<16x388xf32>
    %33 = tpu.matmul %32, %31, %cst_10 {dimension_numbers = #tpu.dot_dimension_numbers<[1], [0], [0], [1], [0, 0, 1, 1], [], []>} : vector<16x24xf32>, vector<24x388xf32>, vector<16x388xf32> -> vector<16x388xf32>
    %c0_11 = arith.constant 0 : index
    %c0_12 = arith.constant 0 : index
    %34 = vector.load %arg6[%c0_11, %c0_12] : memref<16x1xf32, #tpu.memory_space<vmem>>, vector<16x1xf32>
    %35 = vector.broadcast %34 : vector<16x1xf32> to vector<16x388xf32>
    %36 = arith.addf %33, %35 : vector<16x388xf32>
    %cst_13 = arith.constant 0.000000e+00 : f32
    %37 = vector.broadcast %cst_13 : f32 to vector<16x388xf32>
    %38 = arith.maximumf %36, %37 : vector<16x388xf32>
    %c1 = arith.constant 1 : index
    %c0_14 = arith.constant 0 : index
    %39 = vector.load %arg2[%c1, %c0_14] : memref<4x390xf32, #tpu.memory_space<vmem>>, vector<1x388xf32>
    %40 = vector.broadcast %39 : vector<1x388xf32> to vector<16x388xf32>
    %41 = arith.mulf %38, %40 : vector<16x388xf32>
    %42 = vector.extract_strided_slice %41 {offsets = [0, 0], sizes = [16, 386], strides = [1, 1]} : vector<16x388xf32> to vector<16x386xf32>
    %43 = vector.extract_strided_slice %41 {offsets = [0, 1], sizes = [16, 386], strides = [1, 1]} : vector<16x388xf32> to vector<16x386xf32>
    %44 = vector.extract_strided_slice %41 {offsets = [0, 2], sizes = [16, 386], strides = [1, 1]} : vector<16x388xf32> to vector<16x386xf32>
    %45 = tpu.concatenate %42, %43, %44 in 0 : vector<16x386xf32>, vector<16x386xf32>, vector<16x386xf32> -> vector<48x386xf32>
    %c0_15 = arith.constant 0 : index
    %c0_16 = arith.constant 0 : index
    %46 = vector.load %arg7[%c0_15, %c0_16] : memref<32x48xf32, #tpu.memory_space<vmem>>, vector<32x48xf32>
    %cst_17 = arith.constant dense<0.000000e+00> : vector<32x386xf32>
    %47 = tpu.matmul %46, %45, %cst_17 {dimension_numbers = #tpu.dot_dimension_numbers<[1], [0], [0], [1], [0, 0, 1, 1], [], []>} : vector<32x48xf32>, vector<48x386xf32>, vector<32x386xf32> -> vector<32x386xf32>
    %c0_18 = arith.constant 0 : index
    %c0_19 = arith.constant 0 : index
    %48 = vector.load %arg8[%c0_18, %c0_19] : memref<32x1xf32, #tpu.memory_space<vmem>>, vector<32x1xf32>
    %49 = vector.broadcast %48 : vector<32x1xf32> to vector<32x386xf32>
    %50 = arith.addf %47, %49 : vector<32x386xf32>
    %cst_20 = arith.constant 0.000000e+00 : f32
    %51 = vector.broadcast %cst_20 : f32 to vector<32x386xf32>
    %52 = arith.maximumf %50, %51 : vector<32x386xf32>
    %c2 = arith.constant 2 : index
    %c0_21 = arith.constant 0 : index
    %53 = vector.load %arg2[%c2, %c0_21] : memref<4x390xf32, #tpu.memory_space<vmem>>, vector<1x386xf32>
    %54 = vector.broadcast %53 : vector<1x386xf32> to vector<32x386xf32>
    %55 = arith.mulf %52, %54 : vector<32x386xf32>
    %56 = vector.extract_strided_slice %55 {offsets = [0, 0], sizes = [32, 384], strides = [1, 1]} : vector<32x386xf32> to vector<32x384xf32>
    %57 = vector.extract_strided_slice %55 {offsets = [0, 1], sizes = [32, 384], strides = [1, 1]} : vector<32x386xf32> to vector<32x384xf32>
    %58 = vector.extract_strided_slice %55 {offsets = [0, 2], sizes = [32, 384], strides = [1, 1]} : vector<32x386xf32> to vector<32x384xf32>
    %59 = tpu.concatenate %56, %57, %58 in 0 : vector<32x384xf32>, vector<32x384xf32>, vector<32x384xf32> -> vector<96x384xf32>
    %c0_22 = arith.constant 0 : index
    %c0_23 = arith.constant 0 : index
    %60 = vector.load %arg9[%c0_22, %c0_23] : memref<64x96xf32, #tpu.memory_space<vmem>>, vector<64x96xf32>
    %cst_24 = arith.constant dense<0.000000e+00> : vector<64x384xf32>
    %61 = tpu.matmul %60, %59, %cst_24 {dimension_numbers = #tpu.dot_dimension_numbers<[1], [0], [0], [1], [0, 0, 1, 1], [], []>} : vector<64x96xf32>, vector<96x384xf32>, vector<64x384xf32> -> vector<64x384xf32>
    %c0_25 = arith.constant 0 : index
    %c0_26 = arith.constant 0 : index
    %62 = vector.load %arg10[%c0_25, %c0_26] : memref<64x1xf32, #tpu.memory_space<vmem>>, vector<64x1xf32>
    %63 = vector.broadcast %62 : vector<64x1xf32> to vector<64x384xf32>
    %64 = arith.addf %61, %63 : vector<64x384xf32>
    %cst_27 = arith.constant 0.000000e+00 : f32
    %65 = vector.broadcast %cst_27 : f32 to vector<64x384xf32>
    %66 = arith.maximumf %64, %65 : vector<64x384xf32>
    %c3 = arith.constant 3 : index
    %c0_28 = arith.constant 0 : index
    %67 = vector.load %arg2[%c3, %c0_28] : memref<4x390xf32, #tpu.memory_space<vmem>>, vector<1x384xf32>
    %68 = vector.broadcast %67 : vector<1x384xf32> to vector<64x384xf32>
    %69 = arith.mulf %66, %68 : vector<64x384xf32>
    %c0_29 = arith.constant 0 : index
    %c0_30 = arith.constant 0 : index
    %c0_31 = arith.constant 0 : index
    %70 = vector.load %arg11[%c0_29, %c0_30, %c0_31] : memref<1x64x384xf32, #tpu.memory_space<vmem>>, vector<1x64x384xf32>
    %71 = vector.shape_cast %70 : vector<1x64x384xf32> to vector<64x384xf32>
    %72 = vector.shape_cast %69 : vector<64x384xf32> to vector<1x64x384xf32>
    tpu.vector_store %arg11[%c0_29, %c0_30, %c0_31], %72 {strides = array<i32>} : memref<1x64x384xf32, #tpu.memory_space<vmem>>, vector<1x64x384xf32>,
    return
  }
  func.func @transform_0(%arg0: i32) -> (i32, i32, i32) {
    %c0_i32 = arith.constant 0 : i32
    %c0_i32_0 = arith.constant 0 : i32
    %c0_i32_1 = arith.constant 0 : i32
    return %arg0, %c0_i32, %c0_i32_0 : i32, i32, i32
  }
  func.func @transform_1(%arg0: i32) -> (i32, i32) {
    %c0_i32 = arith.constant 0 : i32
    %c0_i32_0 = arith.constant 0 : i32
    %c0_i32_1 = arith.constant 0 : i32
    return %c0_i32, %c0_i32_0 : i32, i32
  }
  func.func @transform_2(%arg0: i32) -> (i32, i32) {
    %c0_i32 = arith.constant 0 : i32
    %c0_i32_0 = arith.constant 0 : i32
    %c0_i32_1 = arith.constant 0 : i32
    return %c0_i32, %c0_i32_0 : i32, i32
  }
  func.func @transform_3(%arg0: i32) -> (i32, i32) {
    %c0_i32 = arith.constant 0 : i32
    %c0_i32_0 = arith.constant 0 : i32
    %c0_i32_1 = arith.constant 0 : i32
    return %c0_i32, %c0_i32_0 : i32, i32
  }
  func.func @transform_4(%arg0: i32) -> (i32, i32) {
    %c0_i32 = arith.constant 0 : i32
    %c0_i32_0 = arith.constant 0 : i32
    %c0_i32_1 = arith.constant 0 : i32
    return %c0_i32, %c0_i32_0 : i32, i32
  }
  func.func @transform_5(%arg0: i32) -> (i32, i32) {
    %c0_i32 = arith.constant 0 : i32
    %c0_i32_0 = arith.constant 0 : i32
    %c0_i32_1 = arith.constant 0 : i32
    return %c0_i32, %c0_i32_0 : i32, i32
  }
  func.func @transform_6(%arg0: i32) -> (i32, i32) {
    %c0_i32 = arith.constant 0 : i32
    %c0_i32_0 = arith.constant 0 : i32
    %c0_i32_1 = arith.constant 0 : i32
    return %c0_i32, %c0_i32_0 : i32, i32
  }
  func.func @transform_7(%arg0: i32) -> (i32, i32) {
    %c0_i32 = arith.constant 0 : i32
    %c0_i32_0 = arith.constant 0 : i32
    %c0_i32_1 = arith.constant 0 : i32
    return %c0_i32, %c0_i32_0 : i32, i32
  }
  func.func @transform_8(%arg0: i32) -> (i32, i32) {
    %c0_i32 = arith.constant 0 : i32
    %c0_i32_0 = arith.constant 0 : i32
    %c0_i32_1 = arith.constant 0 : i32
    return %c0_i32, %c0_i32_0 : i32, i32
  }
  func.func @transform_9(%arg0: i32) -> (i32, i32) {
    %c0_i32 = arith.constant 0 : i32
    %c0_i32_0 = arith.constant 0 : i32
    %c0_i32_1 = arith.constant 0 : i32
    return %c0_i32, %c0_i32_0 : i32, i32
  }
  func.func @transform_10(%arg0: i32) -> (i32, i32, i32) {
    %c0_i32 = arith.constant 0 : i32
    %c0_i32_0 = arith.constant 0 : i32
    %c0_i32_1 = arith.constant 0 : i32
    return %arg0, %c0_i32, %c0_i32_0 : i32, i32, i32
  }
}

</mosaic_0001>

<bundles_post_ra>
// kernel: tpu_custom_call.1
= control target key start
LH: loop header
LB: loop body
LE: loop exit
PB: predicated region body
PF: predicated region fallthrough
CT: control target
= control target key end

     0   :  { %15 = vsyncpa [#allocation3], 0  ;;  %s2258_s0 = inlined_call_operand.vmem [shape: f32[2,1,392], index: 0, kind: input, shape index: {}]   ;;  %s2259_s1 = inlined_call_operand.vmem [shape: f32[4,390], index: 1, kind: input, shape index: {}]   ;;  %s2260_s2 = inlined_call_operand.vmem [shape: f32[8,3], index: 2, kind: input, shape index: {}]   ;;  %s2261_s3 = inlined_call_operand.vmem [shape: f32[8,1], index: 3, kind: input, shape index: {}]   ;;  %s2262_s4 = inlined_call_operand.vmem [shape: f32[16,24], index: 4, kind: input, shape index: {}]   ;;  %s2263_s5 = inlined_call_operand.vmem [shape: f32[16,1], index: 5, kind: input, shape index: {}]   ;;  %s2264_s6 = inlined_call_operand.vmem [shape: f32[32,48], index: 6, kind: input, shape index: {}]   ;;  %s2265_s7 = inlined_call_operand.vmem [shape: f32[32,1], index: 7, kind: input, shape index: {}]   ;;  %s2266_s8 = inlined_call_operand.vmem [shape: f32[64,96], index: 8, kind: input, shape index: {}]   ;;  %s2267_s9 = inlined_call_operand.vmem [shape: f32[64,1], index: 9, kind: input, shape index: {}]   ;;  %s2268_s10 = inlined_call_operand.hbm [shape: f32[2,64,384], index: 10, kind: output, shape index: {}]  }
   0x1   :  { %17 = vsyncpa [#allocation3 + $0x1], 0  ;;  %s1768_s13 = smov 0   ;;  %s1770_s14 = smov 0  }
   0x2   :  { %s1772_s15 = smov 0   ;;  %s1774_s16 = smov 0  }
   0x3 LB: > { %s1789_s17 = sadd.s32 4294967295, %s1704_s16   ;;  %s1400_s18 = sadd.s32 4294967294, %s1704_s16   ;;  %s1704_s16 = sphi %s1774_s16, %s2274_s16   ;;  %s1700_s15 = sphi %s1772_s15, %s2273_s15   ;;  %s1696_s14 = sphi %s1770_s14, %s2272_s14   ;;  %s1692_s13 = sphi %s1768_s13, %s2271_s13  }
   0x4   : > { %s1793_s19 = sadd.s32 1, %s1704_s16   ;;  %s245_s20 = sadd.s32 1, %s1700_s15 }
   0x5   : > { %s242_s21 = ssub.s32 %s1704_s16, %s1793_s19  ;;  %p255_p0 = scmp.ne.s32.totalorder %s1700_s15, %s1696_s14 }
   0x6   : > { %p243_p1 = scmp.eq.s32.totalorder %s242_s21, 0  ;;  %p256_p2 = scmp.eq.s32.totalorder %s1789_s17, 1 }
   0x7   : > { %p261_p3 = scmp.ne.s32.totalorder %s1696_s14, %s1692_s13  ;;  %p262_p4 = scmp.eq.s32.totalorder %s1400_s18, 1 }
   0x8   : > { %s1804_s22 = scalar_select %p243_p1, %s1700_s15, %s245_s20  }
   0x9   : > { %p1806_p5 = por %p256_p2, %p255_p0  ;;  %p1810_p6 = por %p262_p4, %p261_p3 }
   0xa   : > { %p1403_p7 = scmp.ge.s32.totalorder %s1704_s16, 1  ;;  %p314_p8 = scmp.lt.s32.totalorder %s1704_s16, 3 }
   0xc   : > { %p315_p9 = pnand %p1403_p7, %p314_p8 }
   0xd   : > { %p351_p10 = scmp.lt.s32.totalorder (!%p315_p9), %s1789_s17, 1  ;;  %s1709_s12 = smov (!%p315_p9), 127  }
   0xe   : > { %318 = sbr.rel (%p315_p9) target bundleno = 1220 (0x4c4), region = 60  ;;  %s1710_s18 = smov (!%p315_p9), 126  }
   0xf   : > { %s1662_s20 = scalar_lea.hbm (!%p315_p9), %s2268_s10, 384 }
  0x13   : > { %v356_v0 = vld [vmem:[%s2260_s2] sm:$0xff]  ;;  %v1706_v1 = vmov 1   ;;  %v1707_v2 = vmov 0   ;;  %v1708_v3 = vmov 2   ;;  %s352_s27 = scalar_select %p351_p10, %s1789_s17, 1  ;;  %vm395_vm0 = vcmask 1039360  }
  0x14   : > { %1507 = vset.pattern.permute.xlu0 %v1706_v1  ;;  %1509 = vset.pattern.permute.xlu1 %v1707_v2  ;;  %v439_v17 = vld [vmem:[%s2261_s3] sm:$0xff]  ;;  %vm427_vm1 = vcmask 1031168   ;;  %vm515_vm2 = vcmask 195584   ;;  %vm737_vm3 = vcmask 392192   ;;  %vm1093_vm4 = vcmask 785408  }
  0x15   : > { %376 = vperm.xlu0 %1507, %v356_v0   ;;  %359 = vperm.xlu1 %1509, %v356_v0   ;;  %s1404_s28 = sshll.u32 %s352_s27, 2  ;;  %v453_v37 = vld [vmem:[%s2259_s1] ss:$4 sm:$0xf] }
  0x16   : > { %1520 = vset.pattern.permute.xlu2 %v1707_v2  ;;  %s354_s11 = scalar_lea.vmem %s2258_s0, %s1404_s28  ;;  %v456_v43 = vperm.slane %v453_v37, 1  ;;  %v457_v46 = vperm.slane %v453_v37, 2  ;;  %v455_v55 = vperm.slane %v453_v37, 0  ;;  %s348_s28 = sand.u32 1, %s1696_s14  }
  0x17   : > { %v355_v4 = vld [vmem:[%s354_s11] sm:$0xf]  ;;  %s1459_s30 = smul.u32 192, %s348_s28  ;;  %s1323_s27 = scalar_lea.sflag [#allocation3], %s348_s28 }
  0x18   : > { %v365_v5 = vperm.slane %v355_v4, 2  ;;  %v364_v6 = vperm.slane %v355_v4, 1  ;;  %v366_v10 = vperm.slane %v355_v4, 3  ;;  %v363_v15 = vperm.slane %v355_v4, 0 }
  0x19   : > { %s2175_s11 = scalar_lea.vmem [#allocation2], %s1459_s30 }
  0x1d   : > { %1508 = vset.pattern.permute.xlu0 %v1708_v3 }
  0x1e   : > { %408 = vperm.xlu0 %1508, %v356_v0   ;;  %v458_v0 = vperm.slane %v453_v37, 3 }
  0x26   : > { %1561 = vset.pattern.permute.xlu0 %v1707_v2  ;;  %v504_v2 = vld [vmem:[%s2263_s5 + $0x8] sm:$0xff] }
  0x87   : > { %v377_v7 = vpop.permute.xlu0 %376  ;;  %v360_v22 = vpop.permute.xlu1 %359 }
  0x88   : > { %v381_v8 = vmul.f32 %v377_v7, %v365_v5  ;;  %v380_v9 = vmul.f32 %v377_v7, %v364_v6  ;;  %v382_v12 = vmul.f32 %v377_v7, %v366_v10  ;;  %v379_v19 = vmul.f32 %v377_v7, %v363_v15 }
  0x89   : > { %v373_v27 = vmul.f32 %v365_v5, %v360_v22  ;;  %v372_v31 = vmul.f32 %v364_v6, %v360_v22  ;;  %v371_v38 = vmul.f32 %v363_v15, %v360_v22  ;;  %v374_v39 = vmul.f32 %v366_v10, %v360_v22 }
  0x8a   : > { %391 = vrot.lane.b32.xlu2 %v381_v8, %s1709_s12  ;;  %389 = vrot.lane.b32.xlu1 %v380_v9, %s1709_s12 }
  0x90   : > { %v409_v11 = vpop.permute.xlu0 %408 }
  0x91   : > { %v414_v13 = vmul.f32 %v409_v11, %v366_v10  ;;  %v412_v14 = vmul.f32 %v409_v11, %v364_v6  ;;  %v413_v16 = vmul.f32 %v409_v11, %v365_v5  ;;  %v411_v18 = vmul.f32 %v409_v11, %v363_v15 }
  0x92   : > { %393 = vrot.lane.b32.xlu2 %v382_v12, %s1709_s12 }
  0x93   : > { %425 = vrot.lane.b32.xlu0 %v414_v13, %s1710_s18  ;;  %421 = vrot.lane.b32.xlu1 %v412_v14, %s1710_s18  ;;  %v503_v13 = vld [vmem:[%s2263_s5] sm:$0xff] }
  0x94   : > { %v501_v14 = vld [vmem:[%s2262_s4] sm:$0xff] }
  0x9a   : > { %423 = vrot.lane.b32.xlu2 %v413_v16, %s1710_s18 }
  0x9b   : > { %442 = vperm.xlu1 %1509, %v439_v17   ;;  %419 = vrot.lane.b32.xlu0 %v411_v18, %s1710_s18 }
  0xa2   : > { %387 = vrot.lane.b32.xlu2 %v379_v19, %s1709_s12 }
  0xe4   : > { %v392_v20 = vpop.permute.xlu2 %391 }
  0xec   : > { %v394_v21 = vpop.permute.xlu2 %393 }
  0xed   : > { %v398_v28 = vsel %vm395_vm0, %v392_v20, %v394_v21  ;;  %v406_v51 = vadd.f32 %v394_v21, %v374_v39 }
  0xee   : > { %v405_v34 = vadd.f32 %v398_v28, %v373_v27 }
  0xf4   : > { %v424_v24 = vpop.permute.xlu2 %423 }
  0xfc   : > { %v390_v23 = vpop.permute.xlu1 %389  ;;  %v388_v30 = vpop.permute.xlu2 %387 }
  0xfd   : > { %v397_v29 = vsel %vm395_vm0, %v390_v23, %v392_v20  ;;  %v396_v36 = vsel %vm395_vm0, %v388_v30, %v390_v23  ;;  %v502_v20 = vld [vmem:[%s2262_s4 + $0x8] sm:$0xff] }
  0xfe   : > { %v404_v35 = vadd.f32 %v397_v29, %v372_v31  ;;  %v403_v42 = vadd.f32 %v396_v36, %v371_v38  ;;  %v1413_v23 = vld [vmem:[%s2259_s1 + $0x1] ss:$4 sm:$0xf] }
  0xff   : > { %v626_v30 = vperm.slane %v1413_v23, 1 }
 0x105   : > { %v426_v25 = vpop.permute.xlu0 %425  ;;  %v422_v26 = vpop.permute.xlu1 %421 }
 0x106   : > { %v430_v32 = vsel %vm427_vm1, %v424_v24, %v426_v25  ;;  %v429_v33 = vsel %vm427_vm1, %v422_v26, %v424_v24  ;;  %v438_v56 = vadd.f32 %v426_v25, %v406_v51  ;;  %v628_v51 = vperm.slane %v1413_v23, 3 }
 0x107   : > { %v437_v40 = vadd.f32 %v430_v32, %v405_v34  ;;  %v436_v41 = vadd.f32 %v429_v33, %v404_v35 }
 0x10d   : > { %v443_v44 = vpop.permute.xlu1 %442  ;;  %v420_v45 = vpop.permute.xlu0 %419 }
 0x10e   : > { %v446_v47 = vadd.f32 %v443_v44, %v436_v41  ;;  %v447_v48 = vadd.f32 %v443_v44, %v437_v40  ;;  %v428_v49 = vsel %vm427_vm1, %v420_v45, %v422_v26  ;;  %v448_v60 = vadd.f32 %v443_v44, %v438_v56 }
 0x10f   : > { %v435_v50 = vadd.f32 %v428_v49, %v403_v42  ;;  %v625_v26 = vperm.slane %v1413_v23, 0  ;;  %v627_v49 = vperm.slane %v1413_v23, 2 }
 0x110   : > { %v450_v52 = vmax.f32 %v446_v47, 0.0  ;;  %v451_v53 = vmax.f32 %v447_v48, 0.0  ;;  %v452_v63 = vmax.f32 %v448_v60, 0.0 }
 0x111   : > { %v445_v54 = vadd.f32 %v443_v44, %v435_v50 }
 0x112   : > { %v464_v57 = vmul.f32 %v456_v43, %v450_v52  ;;  %v465_v58 = vmul.f32 %v457_v46, %v451_v53  ;;  %v466_v1 = vmul.f32 %v458_v0, %v452_v63 }
 0x113   : > { %v449_v59 = vmax.f32 %v445_v54, 0.0 }
 0x114   : > { %v1510_v61 = vpack.i.bf16 %v465_v58, %v464_v57 }
 0x115   : > { %v463_v62 = vmul.f32 %v455_v55, %v449_v59 }
 0x116   : > { %1511 = vrot.lane.b32.xlu1 %v1510_v61, %s1710_s18  ;;  %1516 = vrot.lane.b32.xlu2 %v1510_v61, %s1709_s12 }
 0x117   : > { %486 = vrot.lane.b32.xlu0 %v463_v62, %s1710_s18 }
 0x11e   : > { %492 = vrot.lane.b32.xlu2 %v466_v1, %s1710_s18  ;;  %471 = vrot.lane.b32.xlu1 %v463_v62, %s1709_s12 }
 0x11f   : > { %477 = vrot.lane.b32.xlu0 %v466_v1, %s1709_s12 }
 0x126   : > { %512 = vperm.xlu1 %1509, %v504_v2   ;;  %507 = vperm.xlu2 %1520, %v503_v13   ;;  %v713_v2 = vld [vmem:[%s2265_s7] sm:$0xff] }
 0x170   : > { %v1517_v3 = vpop.permute.xlu2 %1516 }
 0x171   : > { %v1519_v5 = vunpack.i.h.bf16 %v1517_v3  ;;  %v1518_v6 = vunpack.i.l.bf16 %v1517_v3  ;;  %v714_v3 = vld [vmem:[%s2265_s7 + $0x8] sm:$0xff] }
 0x173   : > { %v480_v12 = vsel %vm395_vm0, %v1518_v6, %v1519_v5 }
 0x178   : > { %v493_v16 = vpop.permute.xlu2 %492 }
 0x180   : > { %v508_v22 = vpop.permute.xlu2 %507 }
 0x188   : > { %v1512_v4 = vpop.permute.xlu1 %1511 }
 0x189   : > { %v1514_v7 = vunpack.i.h.bf16 %v1512_v4  ;;  %v1513_v8 = vunpack.i.l.bf16 %v1512_v4  ;;  %v487_v9 = vpop.permute.xlu0 %486 }
 0x18b   : > { %v494_v10 = vsel %vm427_vm1, %v487_v9, %v1513_v8  ;;  %v495_v11 = vsel %vm427_vm1, %v1513_v8, %v1514_v7  ;;  %v496_v19 = vsel %vm427_vm1, %v1514_v7, %v493_v16 }
 0x18c   : > { %535 = vmatpush.msra.mxu0 %v494_v10  ;;  %558 = vmatpush.msra.mxu3 %v495_v11 }
 0x18e   : > { %559 = vmatpush.msra.mxu3 %v480_v12 }
 0x190   : > { %560 = vmatpush.msra.mxu3 %v464_v57  ;;  %v472_v15 = vpop.permute.xlu1 %471 }
 0x191   : > { %1407 = vmatmul.msk.f32.vlgmr.msra.gmra.mxu3 %vm515_vm2, %v501_v14  ;;  %v478_v17 = vpop.permute.xlu0 %477  ;;  %v479_v18 = vsel %vm395_vm0, %v472_v15, %v1518_v6 }
 0x192   : > { %604 = vmatpush.msrb.mxu3 %v493_v16  ;;  %536 = vmatpush.msra.mxu0 %v479_v18  ;;  %v481_v21 = vsel %vm395_vm0, %v1519_v5, %v478_v17 }
 0x194   : > { %605 = vmatpush.msrb.mxu3 %v478_v17  ;;  %537 = vmatpush.msra.mxu0 %v463_v62 }
 0x195   : > { %1405 = vmatmul.msk.f32.vlgmr.msra.gmra.mxu0 %vm515_vm2, %v501_v14 }
 0x196   : > { %581 = vmatpush.msrb.mxu0 %v496_v19  ;;  %606 = vmatpush.msrb.mxu3 %v466_v1  ;;  %v716_v1 = vld [vmem:[%s2265_s7 + $0x18] sm:$0xff] }
 0x198   : > { %582 = vmatpush.msrb.mxu0 %v481_v21  ;;  %v513_v34 = vpop.permute.xlu1 %512  ;;  %v709_v21 = vld [vmem:[%s2264_s6] sm:$0xff] }
 0x199   : > { %1408 = vmatmul.msk.f32.gmra.mxu3 %vm515_vm2, %v502_v20 }
 0x19a   : > { %583 = vmatpush.msrb.mxu0 %v465_v58 }
 0x19d   : > { %1406 = vmatmul.msk.f32.gmra.mxu0 %vm515_vm2, %v502_v20 }
 0x1a1   : > { %1411 = vmatmul.msk.f32.vlgmr.msrb.gmra.mxu3 %vm515_vm2, %v501_v14 }
 0x1a5   : > { %1409 = vmatmul.msk.f32.vlgmr.msrb.gmra.mxu0 %vm515_vm2, %v501_v14 }
 0x1a9   : > { %1412 = vmatmul.msk.f32.gmra.mxu3 %vm515_vm2, %v502_v20 }
 0x1ad   : > { %1410 = vmatmul.msk.f32.gmra.mxu0 %vm515_vm2, %v502_v20 }
 0x212   : > { %v539_v24 = vpop.f32.mrf.mxu0 }
 0x213   : > { %v540_v25 = vadd.f32 %v539_v24, %v508_v22 }
 0x214   : > { %v562_v27 = vpop.f32.mrf.mxu3 }
 0x215   : > { %v614_v28 = vmax.f32 %v540_v25, 0.0  ;;  %v563_v29 = vadd.f32 %v562_v27, %v508_v22 }
 0x217   : > { %v615_v31 = vmax.f32 %v563_v29, 0.0  ;;  %v1879_v32 = vmul.f32 %v625_v26, %v614_v28  ;;  %v715_v28 = vld [vmem:[%s2265_s7 + $0x10] sm:$0xff] }
 0x219   : > { %v1881_v33 = vmul.f32 %v626_v30, %v615_v31 }
 0x21a   : > { %v542_v35 = vpop.f32.mrf.mxu0 }
 0x21b   : > { %v543_v36 = vadd.f32 %v542_v35, %v513_v34  ;;  %v1521_v37 = vpack.i.bf16 %v1881_v33, %v1879_v32 }
 0x21c   : > { %v565_v38 = vpop.f32.mrf.mxu3 }
 0x21d   : > { %v618_v39 = vmax.f32 %v543_v36, 0.0  ;;  %v566_v40 = vadd.f32 %v565_v38, %v513_v34  ;;  %1522 = vrot.lane.b32.xlu1 %v1521_v37, %s1710_s18  ;;  %v710_v36 = vld [vmem:[%s2264_s6 + $0x8] sm:$0xff] }
 0x21f   : > { %v619_v41 = vmax.f32 %v566_v40, 0.0  ;;  %v637_v42 = vmul.f32 %v625_v26, %v618_v39 }
 0x221   : > { %v1886_v43 = vmul.f32 %v626_v30, %v619_v41 }
 0x222   : > { %v585_v44 = vpop.f32.mrf.mxu0 }
 0x223   : > { %v586_v45 = vadd.f32 %v585_v44, %v508_v22  ;;  %v1531_v46 = vpack.i.bf16 %v1886_v43, %v637_v42 }
 0x224   : > { %v608_v47 = vpop.f32.mrf.mxu3 }
 0x225   : > { %v616_v48 = vmax.f32 %v586_v45, 0.0  ;;  %v609_v50 = vadd.f32 %v608_v47, %v508_v22  ;;  %1532 = vrot.lane.b32.xlu2 %v1531_v46, %s1709_s12  ;;  %1527 = vrot.lane.b32.xlu0 %v1531_v46, %s1710_s18  ;;  %v711_v45 = vld [vmem:[%s2264_s6 + $0x10] sm:$0xff] }
 0x227   : > { %v617_v52 = vmax.f32 %v609_v50, 0.0  ;;  %v1891_v53 = vmul.f32 %v627_v49, %v616_v48 }
 0x229   : > { %v1893_v54 = vmul.f32 %v628_v51, %v617_v52 }
 0x22a   : > { %v588_v55 = vpop.f32.mrf.mxu0 }
 0x22b   : > { %v589_v56 = vadd.f32 %v588_v55, %v513_v34  ;;  %v1541_v57 = vpack.i.bf16 %v1893_v54, %v1891_v53 }
 0x22c   : > { %v611_v58 = vpop.f32.mrf.mxu3 }
 0x22d   : > { %v620_v59 = vmax.f32 %v589_v56, 0.0  ;;  %v612_v60 = vadd.f32 %v611_v58, %v513_v34  ;;  %1537 = vrot.lane.b32.xlu0 %v1521_v37, %s1709_s12  ;;  %1542 = vrot.lane.b32.xlu2 %v1541_v57, %s1710_s18 }
 0x22f   : > { %v621_v61 = vmax.f32 %v612_v60, 0.0  ;;  %v1899_v62 = vmul.f32 %v627_v49, %v620_v59 }
 0x231   : > { %v1901_v63 = vmul.f32 %v628_v51, %v621_v61  ;;  %v1430_v51 = vld [vmem:[%s2259_s1 + $0x2] ss:$4 sm:$0xf] }
 0x232   : > { %v1976_v58 = vperm.slane %v1430_v51, 0  ;;  %v1978_v59 = vperm.slane %v1430_v51, 1 }
 0x233   : > { %v1551_v0 = vpack.i.bf16 %v1901_v63, %v1899_v62 }
 0x235   : > { %1552 = vrot.lane.b32.xlu0 %v1551_v0, %s1709_s12  ;;  %1547 = vrot.lane.b32.xlu1 %v1551_v0, %s1710_s18 }
 0x236   : > { %734 = vperm.xlu2 %1520, %v716_v1  }
 0x23d   : > { %1557 = vrot.lane.b32.xlu1 %v1541_v57, %s1709_s12  ;;  %729 = vperm.xlu0 %1561, %v715_v28  }
 0x23e   : > { %719 = vperm.xlu2 %1520, %v713_v2  }
 0x245   : > { %724 = vperm.xlu1 %1509, %v714_v3  }
 0x27f   : > { %v1533_v5 = vpop.permute.xlu2 %1532 }
 0x280   : > { %v1535_v11 = vunpack.i.h.bf16 %v1533_v5  ;;  %v1534_v12 = vunpack.i.l.bf16 %v1533_v5 }
 0x282   : > { %v668_v15 = vsel %vm395_vm0, %v1534_v12, %v1535_v11 }
 0x287   : > { %v1543_v20 = vpop.permute.xlu2 %1542 }
 0x288   : > { %v1545_v24 = vunpack.i.h.bf16 %v1543_v20  ;;  %v1544_v25 = vunpack.i.l.bf16 %v1543_v20 }
 0x28a   : > { %v697_v35 = vsel %vm427_vm1, %v1544_v25, %v1545_v24 }
 0x28f   : > { %v1523_v4 = vpop.permute.xlu1 %1522 }
 0x290   : > { %v1525_v7 = vunpack.i.h.bf16 %v1523_v4  ;;  %v1524_v8 = vunpack.i.l.bf16 %v1523_v4 }
 0x292   : > { %v695_v14 = vsel %vm427_vm1, %v1524_v8, %v1525_v7 }
 0x297   : > { %v1528_v6 = vpop.permute.xlu0 %1527 }
 0x298   : > { %v1530_v9 = vunpack.i.h.bf16 %v1528_v6  ;;  %v1529_v10 = vunpack.i.l.bf16 %v1528_v6 }
 0x29a   : > { %v698_v13 = vsel %vm427_vm1, %v1529_v10, %v1530_v9 }
 0x29b   : > { %760 = vmatpush.msra.mxu3 %v698_v13 }
 0x29d   : > { %761 = vmatpush.msra.mxu3 %v695_v14  ;;  %v888_v14 = vperm.slane %v1430_v51, 3 }
 0x29f   : > { %v1538_v16 = vpop.permute.xlu0 %1537  ;;  %762 = vmatpush.msra.mxu3 %v668_v15 }
 0x2a0   : > { %v1540_v17 = vunpack.i.h.bf16 %v1538_v16  ;;  %v1539_v18 = vunpack.i.l.bf16 %v1538_v16  ;;  %v887_v16 = vperm.slane %v1430_v51, 2 }
 0x2a2   : > { %v665_v19 = vsel %vm395_vm0, %v1539_v18, %v1540_v17 }
 0x2a3   : > { %763 = vmatpush.msra.mxu3 %v665_v19 }
 0x2a5   : > { %764 = vmatpush.msra.mxu3 %v637_v42 }
 0x2a7   : > { %v1548_v22 = vpop.permute.xlu1 %1547  ;;  %v1553_v23 = vpop.permute.xlu0 %1552  ;;  %765 = vmatpush.msra.mxu3 %v1879_v32  ;;  %v696_v32 = vsel %vm427_vm1, %v1525_v7, %v1544_v25 }
 0x2a8   : > { %v1550_v26 = vunpack.i.h.bf16 %v1548_v22  ;;  %v1549_v27 = vunpack.i.l.bf16 %v1548_v22  ;;  %1414 = vmatmul.msk.f32.vlgmr.msra.gmra.mxu3 %vm737_vm3, %v709_v21  ;;  %v1555_v29 = vunpack.i.h.bf16 %v1553_v23  ;;  %v1554_v30 = vunpack.i.l.bf16 %v1553_v23 }
 0x2aa   : > { %847 = vmatpush.msrb.mxu3 %v1550_v26  ;;  %v699_v31 = vsel %vm427_vm1, %v1530_v9, %v1549_v27  ;;  %v700_v34 = vsel %vm427_vm1, %v1549_v27, %v1550_v26  ;;  %v669_v37 = vsel %vm395_vm0, %v1535_v11, %v1554_v30  ;;  %v670_v38 = vsel %vm395_vm0, %v1554_v30, %v1555_v29 }
 0x2ab   : > { %789 = vmatpush.msra.mxu1 %v699_v31  ;;  %818 = vmatpush.msra.mxu2 %v700_v34 }
 0x2ac   : > { %848 = vmatpush.msrb.mxu3 %v1545_v24 }
 0x2ad   : > { %790 = vmatpush.msra.mxu1 %v696_v32  ;;  %819 = vmatpush.msra.mxu2 %v697_v35 }
 0x2ae   : > { %849 = vmatpush.msrb.mxu3 %v1555_v29 }
 0x2af   : > { %v1558_v39 = vpop.permute.xlu1 %1557  ;;  %791 = vmatpush.msra.mxu1 %v669_v37  ;;  %820 = vmatpush.msra.mxu2 %v670_v38  ;;  %v730_v56 = vpop.permute.xlu0 %729 }
 0x2b0   : > { %v1560_v40 = vunpack.i.h.bf16 %v1558_v39  ;;  %v1559_v41 = vunpack.i.l.bf16 %v1558_v39  ;;  %1415 = vmatmul.msk.f32.gmra.mxu3 %vm737_vm3, %v710_v36 }
 0x2b2   : > { %850 = vmatpush.msrb.mxu3 %v1560_v40  ;;  %v666_v42 = vsel %vm395_vm0, %v1540_v17, %v1559_v41  ;;  %v667_v44 = vsel %vm395_vm0, %v1559_v41, %v1560_v40 }
 0x2b3   : > { %792 = vmatpush.msra.mxu1 %v666_v42  ;;  %821 = vmatpush.msra.mxu2 %v667_v44 }
 0x2b4   : > { %851 = vmatpush.msrb.mxu3 %v1901_v63 }
 0x2b5   : > { %793 = vmatpush.msra.mxu1 %v1886_v43  ;;  %822 = vmatpush.msra.mxu2 %v1899_v62  ;;  %v712_v43 = vld [vmem:[%s2264_s6 + $0x18] sm:$0xff] }
 0x2b6   : > { %852 = vmatpush.msrb.mxu3 %v1893_v54 }
 0x2b7   : > { %794 = vmatpush.msra.mxu1 %v1881_v33  ;;  %823 = vmatpush.msra.mxu2 %v1891_v53  ;;  %v725_v48 = vpop.permute.xlu1 %724  ;;  %v1974_v53 = vpop.permute.xlu2 %734 }
 0x2b8   : > { %1416 = vmatmul.msk.f32.gmra.mxu3 %vm737_vm3, %v711_v45  ;;  %1418 = vmatmul.msk.f32.vlgmr.msra.gmra.mxu1 %vm737_vm3, %v709_v21 }
 0x2b9   : > { %1422 = vmatmul.msk.f32.vlgmr.msra.gmra.mxu2 %vm737_vm3, %v709_v21 }
 0x2bf   : > { %v720_v6 = vpop.permute.xlu2 %719 }
 0x2c0   : > { %1417 = vmatmul.msk.f32.gmra.mxu3 %vm737_vm3, %v712_v43  ;;  %1419 = vmatmul.msk.f32.gmra.mxu1 %vm737_vm3, %v710_v36 }
 0x2c1   : > { %1423 = vmatmul.msk.f32.gmra.mxu2 %vm737_vm3, %v710_v36 }
 0x2c8   : > { %1420 = vmatmul.msk.f32.gmra.mxu1 %vm737_vm3, %v711_v45  ;;  %1426 = vmatmul.msk.f32.vlgmr.msrb.gmra.mxu3 %vm737_vm3, %v709_v21 }
 0x2c9   : > { %1424 = vmatmul.msk.f32.gmra.mxu2 %vm737_vm3, %v711_v45 }
 0x2d0   : > { %1421 = vmatmul.msk.f32.gmra.mxu1 %vm737_vm3, %v712_v43  ;;  %1427 = vmatmul.msk.f32.gmra.mxu3 %vm737_vm3, %v710_v36 }
 0x2d1   : > { %1425 = vmatmul.msk.f32.gmra.mxu2 %vm737_vm3, %v712_v43 }
 0x2d8   : > { %1428 = vmatmul.msk.f32.gmra.mxu3 %vm737_vm3, %v711_v45 }
 0x2e0   : > { %1429 = vmatmul.msk.f32.gmra.mxu3 %vm737_vm3, %v712_v43 }
 0x32b   : > { %v1967_v33 = vpop.f32.mrf.mxu3 }
 0x333   : > { %v770_v46 = vpop.f32.mrf.mxu3 }
 0x334   : > { %v771_v49 = vadd.f32 %v770_v46, %v725_v48 }
 0x335   : > { %v1969_v47 = vpop.f32.mrf.mxu1 }
 0x336   : > { %v870_v54 = vmax.f32 %v771_v49, 0.0 }
 0x338   : > { %v1981_v61 = vmul.f32 %v1976_v58, %v870_v54  ;;  %v797_v54 = vadd.f32 %v1969_v47, %v720_v6 }
 0x33b   : > { %v773_v50 = vpop.f32.mrf.mxu3 }
 0x33c   : > { %v825_v57 = vpop.f32.mrf.mxu2  ;;  %v774_v62 = vadd.f32 %v773_v50, %v730_v56 }
 0x33d   : > { %v799_v52 = vpop.f32.mrf.mxu1  ;;  %v826_v9 = vadd.f32 %v825_v57, %v720_v6 }
 0x33e   : > { %v800_v55 = vadd.f32 %v799_v52, %v725_v48  ;;  %v874_v3 = vmax.f32 %v774_v62, 0.0  ;;  %v867_v62 = vmax.f32 %v797_v54, 0.0 }
 0x33f   : > { %v868_v18 = vmax.f32 %v826_v9, 0.0 }
 0x340   : > { %v871_v60 = vmax.f32 %v800_v55, 0.0  ;;  %v1993_v8 = vmul.f32 %v1976_v58, %v874_v3  ;;  %v1047_v3 = vld [vmem:[%s2267_s9 + $0x10] sm:$0xff] }
 0x341   : > { %v2003_v25 = vmul.f32 %v887_v16, %v868_v18 }
 0x342   : > { %v1984_v63 = vmul.f32 %v1978_v59, %v871_v60 }
 0x343   : > { %v776_v0 = vpop.f32.mrf.mxu3 }
 0x344   : > { %v1988_v1 = vpack.i.bf16 %v1984_v63, %v1981_v61  ;;  %v828_v7 = vpop.f32.mrf.mxu2  ;;  %v777_v10 = vadd.f32 %v776_v0, %v1974_v53 }
 0x345   : > { %v802_v2 = vpop.f32.mrf.mxu1  ;;  %v829_v22 = vadd.f32 %v828_v7, %v725_v48  ;;  %v1052_v7 = vld [vmem:[%s2267_s9 + $0x38] sm:$0xff] }
 0x346   : > { %v803_v4 = vadd.f32 %v802_v2, %v730_v56  ;;  %1563 = vrot.lane.b32.xlu0 %v1988_v1, %s1710_s18  ;;  %v878_v19 = vmax.f32 %v777_v10, 0.0 }
 0x347   : > { %v872_v30 = vmax.f32 %v829_v22, 0.0 }
 0x348   : > { %v875_v5 = vmax.f32 %v803_v4, 0.0  ;;  %v2006_v26 = vmul.f32 %v1976_v58, %v878_v19  ;;  %v1049_v4 = vld [vmem:[%s2267_s9 + $0x20] sm:$0xff] }
 0x349   : > { %v2016_v36 = vmul.f32 %v887_v16, %v872_v30 }
 0x34a   : > { %v1997_v11 = vmul.f32 %v1978_v59, %v875_v5  ;;  %v1050_v5 = vld [vmem:[%s2267_s9 + $0x28] sm:$0xff] }
 0x34b   : > { %v854_v12 = vpop.f32.mrf.mxu3 }
 0x34c   : > { %v855_v13 = vadd.f32 %v854_v12, %v720_v6  ;;  %v1567_v15 = vpack.i.bf16 %v1997_v11, %v1993_v8  ;;  %v831_v28 = vpop.f32.mrf.mxu2 }
 0x34d   : > { %v805_v17 = vpop.f32.mrf.mxu1  ;;  %v832_v37 = vadd.f32 %v831_v28, %v730_v56 }
 0x34e   : > { %v869_v20 = vmax.f32 %v855_v13, 0.0  ;;  %v806_v21 = vadd.f32 %v805_v17, %v1974_v53  ;;  %1568 = vrot.lane.b32.xlu1 %v1567_v15, %s1710_s18 }
 0x34f   : > { %v876_v41 = vmax.f32 %v832_v37, 0.0 }
 0x350   : > { %v896_v23 = vmul.f32 %v888_v14, %v869_v20  ;;  %v879_v24 = vmax.f32 %v806_v21, 0.0 }
 0x351   : > { %v2020_v43 = vmul.f32 %v887_v16, %v876_v41 }
 0x352   : > { %v2009_v27 = vmul.f32 %v1978_v59, %v879_v24  ;;  %v1577_v32 = vpack.i.bf16 %v896_v23, %v2003_v25 }
 0x353   : > { %v857_v29 = vpop.f32.mrf.mxu3 }
 0x354   : > { %v858_v31 = vadd.f32 %v857_v29, %v725_v48  ;;  %v1572_v34 = vpack.i.bf16 %v2009_v27, %v2006_v26  ;;  %v834_v44 = vpop.f32.mrf.mxu2 }
 0x355   : > { %v835_v46 = vadd.f32 %v834_v44, %v1974_v53 }
 0x356   : > { %v873_v35 = vmax.f32 %v858_v31, 0.0  ;;  %1573 = vrot.lane.b32.xlu2 %v1572_v34, %s1710_s18  ;;  %1578 = vrot.lane.b32.xlu1 %v1577_v32, %s1710_s18 }
 0x357   : > { %v880_v51 = vmax.f32 %v835_v46, 0.0 }
 0x358   : > { %v900_v38 = vmul.f32 %v888_v14, %v873_v35 }
 0x359   : > { %v2028_v57 = vmul.f32 %v887_v16, %v880_v51 }
 0x35a   : > { %v1582_v39 = vpack.i.bf16 %v900_v38, %v2016_v36 }
 0x35b   : > { %v860_v40 = vpop.f32.mrf.mxu3 }
 0x35c   : > { %v861_v42 = vadd.f32 %v860_v40, %v730_v56  ;;  %1583 = vrot.lane.b32.xlu0 %v1582_v39, %s1710_s18  ;;  %v768_v56 = vadd.f32 %v1967_v33, %v720_v6  ;;  %v1051_v6 = vld [vmem:[%s2267_s9 + $0x30] sm:$0xff] }
 0x35e   : > { %v877_v45 = vmax.f32 %v861_v42, 0.0  ;;  %v866_v2 = vmax.f32 %v768_v56, 0.0 }
 0x360   : > { %v904_v48 = vmul.f32 %v888_v14, %v877_v45  ;;  %v2038_v47 = vmul.f32 %v1976_v58, %v866_v2  ;;  %v1045_v58 = vld [vmem:[%s2267_s9] sm:$0xff] }
 0x362   : > { %v1587_v49 = vpack.i.bf16 %v904_v48, %v2020_v43 }
 0x363   : > { %v863_v50 = vpop.f32.mrf.mxu3 }
 0x364   : > { %v864_v52 = vadd.f32 %v863_v50, %v1974_v53  ;;  %1588 = vrot.lane.b32.xlu2 %v1587_v49, %s1710_s18  ;;  %v2035_v53 = vmul.f32 %v1978_v59, %v867_v62  ;;  %v1046_v59 = vld [vmem:[%s2267_s9 + $0x8] sm:$0xff] }
 0x366   : > { %v881_v55 = vmax.f32 %v864_v52, 0.0  ;;  %v1607_v33 = vpack.i.bf16 %v2035_v53, %v2038_v47 }
 0x368   : > { %v908_v60 = vmul.f32 %v888_v14, %v881_v55 }
 0x36a   : > { %v1597_v0 = vpack.i.bf16 %v908_v60, %v2028_v57 }
 0x36c   : > { %1593 = vrot.lane.b32.xlu2 %v1587_v49, %s1709_s12  ;;  %1598 = vrot.lane.b32.xlu1 %v1597_v0, %s1710_s18 }
 0x36d   : > { %1613 = vrot.lane.b32.xlu0 %v1597_v0, %s1709_s12 }
 0x374   : > { %1603 = vrot.lane.b32.xlu1 %v1582_v39, %s1709_s12  ;;  %1608 = vrot.lane.b32.xlu2 %v1607_v33, %s1710_s18  ;;  %s1460_s18 = smul.u32 192, %s1789_s17  ;;  %s1335_s17 = sshll.u32 %s2175_s11, 4  ;;  %s1336_s17 = int_to_ptr.vmem [resolvable:$true] %s1335_s17 }
 0x375   : > { %1618 = vrot.lane.b32.xlu0 %v1577_v32, %s1709_s12 }
 0x376   : > { %s1334_s25 = scalar_lea.hbm %s2268_s10, %s1460_s18 }
 0x377   : > { %s1337_s26 = sshll.u32 %s1334_s25, 4  ;;  %s1338_s26 = int_to_ptr.hbm [resolvable:$true] %s1337_s26 }
 0x378   : > { %s1656_s29 = sshra.s32 %s1338_s26, 4  ;;  %s1657_s29 = int_to_ptr.hbm [resolvable:$true] %s1656_s29 }
 0x379   : > { %p1663_p0 = scmp.lt.s32.totalorder %s1657_s29, %s2268_s10 }
 0x37c   : > { %1623 = vrot.lane.b32.xlu1 %v1572_v34, %s1709_s12  ;;  %1628 = vrot.lane.b32.xlu2 %v1567_v15, %s1709_s12 }
 0x37d   : > { %1633 = vrot.lane.b32.xlu0 %v1988_v1, %s1709_s12  ;;  %v1048_v1 = vld [vmem:[%s2267_s9 + $0x18] sm:$0xff] }
 0x384   : > { %1638 = vrot.lane.b32.xlu1 %v1607_v33, %s1709_s12  ;;  %1055 = vperm.xlu2 %1520, %v1045_v58   ;;  %s1658_s12 = scalar_lea.hbm %s1657_s29, 192 }
 0x385   : > { %1060 = vperm.xlu0 %1561, %v1046_v59   ;;  %p1659_p11 = scmp.ne.s32.totalorder %s1657_s29, %s1658_s12  ;;  %p1664_p1 = scmp.lt.s32.totalorder %s1662_s20, %s1658_s12 }
 0x387   : > { %p1660_p12 = pnand %p1659_p11, %p1806_p5  ;;  %p1665_p2 = por %p1664_p1, %p1663_p0 }
 0x389   : > { %p1661_p13 = pneg %p1660_p12 }
 0x38b   : > { %p1666_p3 = pnand %p1665_p2, %p1661_p13 }
 0x38c   : > { %1065 = vperm.xlu1 %1509, %v1047_v3   ;;  %1070 = vperm.xlu2 %1520, %v1048_v1  }
 0x38d   : > { %1075 = vperm.xlu0 %1561, %v1049_v4  }
 0x394   : > { %1080 = vperm.xlu1 %1509, %v1050_v5   ;;  %1085 = vperm.xlu2 %1520, %v1051_v6  }
 0x395   : > { %1090 = vperm.xlu0 %1561, %v1052_v7  }
 0x3b0   : > { %v1574_v9 = vpop.permute.xlu2 %1573 }
 0x3b1   : > { %v1576_v10 = vunpack.i.h.bf16 %v1574_v9  ;;  %v1575_v12 = vunpack.i.l.bf16 %v1574_v9 }
 0x3b3   : > { %v1022_v13 = vsel %vm427_vm1, %v1575_v12, %v1576_v10 }
 0x3b4   : > { %1122 = vmatpush.msra.mxu0 %v1022_v13 }
 0x3b8   : > { %v1564_v14 = vpop.permute.xlu0 %1563 }
 0x3b9   : > { %v1566_v17 = vunpack.i.h.bf16 %v1564_v14  ;;  %v1565_v18 = vunpack.i.l.bf16 %v1564_v14 }
 0x3bb   : > { %v1016_v22 = vsel %vm427_vm1, %v1565_v18, %v1566_v17 }
 0x3be   : > { %v1589_v15 = vpop.permute.xlu2 %1588 }
 0x3bf   : > { %v1591_v35 = vunpack.i.h.bf16 %v1589_v15  ;;  %v1590_v37 = vunpack.i.l.bf16 %v1589_v15 }
 0x3c0   : > { %v1569_v16 = vpop.permute.xlu1 %1568 }
 0x3c1   : > { %v1571_v19 = vunpack.i.h.bf16 %v1569_v16  ;;  %v1570_v20 = vunpack.i.l.bf16 %v1569_v16  ;;  %v1021_v50 = vsel %vm427_vm1, %v1590_v37, %v1591_v35 }
 0x3c3   : > { %v1019_v21 = vsel %vm427_vm1, %v1570_v20, %v1571_v19  ;;  %v1020_v49 = vsel %vm427_vm1, %v1571_v19, %v1590_v37 }
 0x3c4   : > { %1123 = vmatpush.msra.mxu0 %v1019_v21 }
 0x3c6   : > { %v2077_v23 = vpop.permute.xlu2 %1593  ;;  %1124 = vmatpush.msra.mxu0 %v1016_v22 }
 0x3c7   : > { %v1596_v60 = vunpack.i.h.bf16 %v2077_v23  ;;  %v1595_v62 = vunpack.i.l.bf16 %v2077_v23 }
 0x3c8   : > { %v1579_v31 = vpop.permute.xlu1 %1578 }
 0x3c9   : > { %v1581_v46 = vunpack.i.h.bf16 %v1579_v31  ;;  %v1580_v48 = vunpack.i.l.bf16 %v1579_v31  ;;  %v965_v6 = vsel %vm395_vm0, %v1595_v62, %v1596_v60 }
 0x3cb   : > { %v1015_v33 = vsel %vm427_vm1, %v1580_v48, %v1581_v46 }
 0x3ce   : > { %v1609_v24 = vpop.permute.xlu2 %1608  ;;  %v1584_v34 = vpop.permute.xlu0 %1583 }
 0x3cf   : > { %v1611_v28 = vunpack.i.h.bf16 %v1609_v24  ;;  %v1610_v29 = vunpack.i.l.bf16 %v1609_v24  ;;  %v1586_v41 = vunpack.i.h.bf16 %v1584_v34  ;;  %v1585_v42 = vunpack.i.l.bf16 %v1584_v34 }
 0x3d1   : > { %v1013_v30 = vsel %vm427_vm1, %v1610_v29, %v1611_v28  ;;  %v1017_v54 = vsel %vm427_vm1, %v1566_v17, %v1585_v42  ;;  %v1018_v55 = vsel %vm427_vm1, %v1585_v42, %v1586_v41  ;;  %v1014_v2 = vsel %vm427_vm1, %v1611_v28, %v1580_v48 }
 0x3d2   : > { %1125 = vmatpush.msra.mxu0 %v1013_v30 }
 0x3d6   : > { %v1629_v1 = vpop.permute.xlu2 %1628 }
 0x3d7   : > { %v1631_v9 = vunpack.i.h.bf16 %v1629_v1  ;;  %v1630_v12 = vunpack.i.l.bf16 %v1629_v1 }
 0x3d9   : > { %v963_v21 = vsel %vm395_vm0, %v1630_v12, %v1631_v9  ;;  %v964_v22 = vsel %vm395_vm0, %v1631_v9, %v1595_v62 }
 0x3de   : > { %v1599_v32 = vpop.permute.xlu1 %1598 }
 0x3df   : > { %v1601_v38 = vunpack.i.h.bf16 %v1599_v32  ;;  %v1600_v39 = vunpack.i.l.bf16 %v1599_v32  ;;  %v1614_v40 = vpop.permute.xlu0 %1613 }
 0x3e0   : > { %v1616_v51 = vunpack.i.h.bf16 %v1614_v40  ;;  %v1615_v52 = vunpack.i.l.bf16 %v1614_v40 }
 0x3e1   : > { %v1023_v44 = vsel %vm427_vm1, %v1576_v10, %v1600_v39  ;;  %v1024_v45 = vsel %vm427_vm1, %v1600_v39, %v1601_v38 }
 0x3e2   : > { %1163 = vmatpush.msrb.mxu1 %v1023_v44  ;;  %1204 = vmatpush.msrb.mxu2 %v1024_v45  ;;  %v968_v3 = vsel %vm395_vm0, %v1615_v52, %v1616_v51 }
 0x3e4   : > { %1164 = vmatpush.msrb.mxu1 %v1020_v49  ;;  %1205 = vmatpush.msrb.mxu2 %v1021_v50 }
 0x3e6   : > { %v1604_v56 = vpop.permute.xlu1 %1603  ;;  %1165 = vmatpush.msrb.mxu1 %v1017_v54  ;;  %1206 = vmatpush.msrb.mxu2 %v1018_v55 }
 0x3e7   : > { %v1619_v0 = vpop.permute.xlu0 %1618  ;;  %v1606_v58 = vunpack.i.h.bf16 %v1604_v56  ;;  %v1605_v59 = vunpack.i.l.bf16 %v1604_v56 }
 0x3e8   : > { %1166 = vmatpush.msrb.mxu1 %v1014_v2  ;;  %1207 = vmatpush.msrb.mxu2 %v1015_v33  ;;  %v1621_v4 = vunpack.i.h.bf16 %v1619_v0  ;;  %v1620_v5 = vunpack.i.l.bf16 %v1619_v0 }
 0x3e9   : > { %v962_v7 = vsel %vm395_vm0, %v1605_v59, %v1606_v58 }
 0x3ea   : > { %1208 = vmatpush.msrb.mxu2 %v968_v3  ;;  %v959_v16 = vsel %vm395_vm0, %v1620_v5, %v1621_v4 }
 0x3ec   : > { %1209 = vmatpush.msrb.mxu2 %v965_v6 }
 0x3ee   : > { %v1624_v10 = vpop.permute.xlu1 %1623  ;;  %1210 = vmatpush.msrb.mxu2 %v962_v7 }
 0x3ef   : > { %v1626_v13 = vunpack.i.h.bf16 %v1624_v10  ;;  %v1625_v14 = vunpack.i.l.bf16 %v1624_v10  ;;  %v1634_v15 = vpop.permute.xlu0 %1633 }
 0x3f0   : > { %1211 = vmatpush.msrb.mxu2 %v959_v16  ;;  %v1636_v17 = vunpack.i.h.bf16 %v1634_v15  ;;  %v1635_v18 = vunpack.i.l.bf16 %v1634_v15 }
 0x3f1   : > { %v966_v19 = vsel %vm395_vm0, %v1625_v14, %v1626_v13  ;;  %v967_v20 = vsel %vm395_vm0, %v1626_v13, %v1615_v52 }
 0x3f2   : > { %1126 = vmatpush.msra.mxu0 %v966_v19  ;;  %1167 = vmatpush.msrb.mxu1 %v967_v20  ;;  %v960_v23 = vsel %vm395_vm0, %v1635_v18, %v1636_v17  ;;  %v961_v24 = vsel %vm395_vm0, %v1636_v17, %v1605_v59 }
 0x3f3   : > { %1212 = vmatpush.msrb.mxu2 %v2028_v57  ;;  %v1037_v57 = vld [vmem:[%s2266_s8] sm:$0xff] }
 0x3f4   : > { %1127 = vmatpush.msra.mxu0 %v963_v21  ;;  %1168 = vmatpush.msrb.mxu1 %v964_v22 }
 0x3f5   : > { %1213 = vmatpush.msrb.mxu2 %v2020_v43 }
 0x3f6   : > { %v1639_v28 = vpop.permute.xlu1 %1638  ;;  %1128 = vmatpush.msra.mxu0 %v960_v23  ;;  %1169 = vmatpush.msrb.mxu1 %v961_v24 }
 0x3f7   : > { %1214 = vmatpush.msrb.mxu2 %v2016_v36  ;;  %v1641_v29 = vunpack.i.h.bf16 %v1639_v28  ;;  %v1640_v30 = vunpack.i.l.bf16 %v1639_v28  ;;  %v1455_v36 = vld [vmem:[%s2259_s1 + $0x3] ss:$4 sm:$0x7]  ;;  %v1061_v48 = vpop.permute.xlu0 %1060 }
 0x3f8   : > { %v2168_v32 = vperm.slane %v1455_v36, 2  ;;  %v2170_v39 = vperm.slane %v1455_v36, 0  ;;  %v2173_v44 = vperm.slane %v1455_v36, 1 }
 0x3f9   : > { %1215 = vmatpush.msrb.mxu2 %v2003_v25  ;;  %v957_v43 = vsel %vm395_vm0, %v1640_v30, %v1641_v29  ;;  %v958_v31 = vsel %vm395_vm0, %v1641_v29, %v1620_v5  ;;  %v1038_v25 = vld [vmem:[%s2266_s8 + $0x8] sm:$0xff] }
 0x3fa   : > { %1447 = vmatmul.msk.f32.vlgmr.msrb.gmra.mxu2 %vm1093_vm4, %v1037_v57  ;;  %1129 = vmatpush.msra.mxu0 %v957_v43 }
 0x3fb   : > { %1170 = vmatpush.msrb.mxu1 %v958_v31 }
 0x3fc   : > { %1130 = vmatpush.msra.mxu0 %v2006_v26  ;;  %v1043_v26 = vld [vmem:[%s2266_s8 + $0x30] sm:$0xff] }
 0x3fd   : > { %1171 = vmatpush.msrb.mxu1 %v2009_v27  ;;  %v1044_v27 = vld [vmem:[%s2266_s8 + $0x38] sm:$0xff] }
 0x3fe   : > { %1131 = vmatpush.msra.mxu0 %v1993_v8  ;;  %v1039_v8 = vld [vmem:[%s2266_s8 + $0x10] sm:$0xff]  ;;  %v1066_v58 = vpop.permute.xlu1 %1065 }
 0x3ff   : > { %1172 = vmatpush.msrb.mxu1 %v1997_v11  ;;  %v1042_v11 = vld [vmem:[%s2266_s8 + $0x28] sm:$0xff] }
 0x400   : > { %1132 = vmatpush.msra.mxu0 %v1981_v61  ;;  %v1040_v61 = vld [vmem:[%s2266_s8 + $0x18] sm:$0xff] }
 0x401   : > { %1173 = vmatpush.msrb.mxu1 %v1984_v63  ;;  %v1041_v63 = vld [vmem:[%s2266_s8 + $0x20] sm:$0xff] }
 0x402   : > { %1448 = vmatmul.msk.f32.gmra.mxu2 %vm1093_vm4, %v1038_v25  ;;  %1133 = vmatpush.msra.mxu0 %v2038_v47 }
 0x403   : > { %1174 = vmatpush.msrb.mxu1 %v2035_v53  ;;  %1431 = vmatmul.msk.f32.vlgmr.msra.gmra.mxu0 %vm1093_vm4, %v1037_v57  ;;  %v1056_v53 = vpop.permute.xlu2 %1055 }
 0x404   : > { %1439 = vmatmul.msk.f32.vlgmr.msrb.gmra.mxu1 %vm1093_vm4, %v1037_v57  ;;  %v1076_v57 = vpop.permute.xlu0 %1075 }
 0x40a   : > { %1449 = vmatmul.msk.f32.gmra.mxu2 %vm1093_vm4, %v1039_v8 }
 0x40b   : > { %1432 = vmatmul.msk.f32.gmra.mxu0 %vm1093_vm4, %v1038_v25  ;;  %v1071_v15 = vpop.permute.xlu2 %1070 }
 0x40c   : > { %1440 = vmatmul.msk.f32.gmra.mxu1 %vm1093_vm4, %v1038_v25 }
 0x412   : > { %1450 = vmatmul.msk.f32.gmra.mxu2 %vm1093_vm4, %v1040_v61 }
 0x413   : > { %1433 = vmatmul.msk.f32.gmra.mxu0 %vm1093_vm4, %v1039_v8 }
 0x414   : > { %1441 = vmatmul.msk.f32.gmra.mxu1 %vm1093_vm4, %v1039_v8 }
 0x41a   : > { %1451 = vmatmul.msk.f32.gmra.mxu2 %vm1093_vm4, %v1041_v63 }
 0x41b   : > { %1434 = vmatmul.msk.f32.gmra.mxu0 %vm1093_vm4, %v1040_v61 }
 0x41c   : > { %1442 = vmatmul.msk.f32.gmra.mxu1 %vm1093_vm4, %v1040_v61 }
 0x422   : > { %1452 = vmatmul.msk.f32.gmra.mxu2 %vm1093_vm4, %v1042_v11 }
 0x423   : > { %1435 = vmatmul.msk.f32.gmra.mxu0 %vm1093_vm4, %v1041_v63 }
 0x424   : > { %1443 = vmatmul.msk.f32.gmra.mxu1 %vm1093_vm4, %v1041_v63 }
 0x42a   : > { %1453 = vmatmul.msk.f32.gmra.mxu2 %vm1093_vm4, %v1043_v26 }
 0x42b   : > { %1436 = vmatmul.msk.f32.gmra.mxu0 %vm1093_vm4, %v1042_v11 }
 0x42c   : > { %1444 = vmatmul.msk.f32.gmra.mxu1 %vm1093_vm4, %v1042_v11 }
 0x432   : > { %1454 = vmatmul.msk.f32.gmra.mxu2 %vm1093_vm4, %v1044_v27 }
 0x433   : > { %1437 = vmatmul.msk.f32.gmra.mxu0 %vm1093_vm4, %v1043_v26 }
 0x434   : > { %1445 = vmatmul.msk.f32.gmra.mxu1 %vm1093_vm4, %v1043_v26 }
 0x43b   : > { %1438 = vmatmul.msk.f32.gmra.mxu0 %vm1093_vm4, %v1044_v27 }
 0x43c   : > { %1446 = vmatmul.msk.f32.gmra.mxu1 %vm1093_vm4, %v1044_v27 }
 0x47d   : > { %v1217_v47 = vpop.f32.mrf.mxu2 }
 0x47e   : > { %v1218_v34 = vadd.f32 %v1217_v47, %v1056_v53 }
 0x480   : > { %v1243_v35 = vmax.f32 %v1218_v34, 0.0  ;;  %v1135_v37 = vpop.f32.mrf.mxu0  ;;  %v1081_v34 = vpop.permute.xlu1 %1080 }
 0x481   : > { %v1136_v38 = vadd.f32 %v1135_v37, %v1056_v53  ;;  %v1176_v40 = vpop.f32.mrf.mxu1 }
 0x482   : > { %v1276_v41 = vmul.f32 %v2168_v32, %v1243_v35  ;;  %v1177_v42 = vadd.f32 %v1176_v40, %v1056_v53 }
 0x483   : > { %v1241_v45 = vmax.f32 %v1136_v38, 0.0 }
 0x484   : > { %1300 = vst [vmem:[%s2175_s11 + $0x10] sm:$0xff] %v1276_v41  ;;  %v1242_v46 = vmax.f32 %v1177_v42, 0.0 }
 0x485   : > { %v1274_v49 = vmul.f32 %v2170_v39, %v1241_v45  ;;  %v1220_v50 = vpop.f32.mrf.mxu2 }
 0x486   : > { %v1275_v51 = vmul.f32 %v2173_v44, %v1242_v46  ;;  %v1221_v52 = vadd.f32 %v1220_v50, %v1061_v48 }
 0x487   : > { %1298 = vst [vmem:[%s2175_s11] sm:$0xff] %v1274_v49 }
 0x488   : > { %1299 = vst [vmem:[%s2175_s11 + $0x8] sm:$0xff] %v1275_v51  ;;  %v1246_v54 = vmax.f32 %v1221_v52, 0.0  ;;  %v1138_v55 = vpop.f32.mrf.mxu0  ;;  %v1086_v52 = vpop.permute.xlu2 %1085 }
 0x489   : > { %v1139_v56 = vadd.f32 %v1138_v55, %v1061_v48  ;;  %v1179_v60 = vpop.f32.mrf.mxu1 }
 0x48a   : > { %v1279_v62 = vmul.f32 %v2168_v32, %v1246_v54  ;;  %v1180_v0 = vadd.f32 %v1179_v60, %v1061_v48 }
 0x48b   : > { %v1244_v2 = vmax.f32 %v1139_v56, 0.0 }
 0x48c   : > { %1303 = vst [vmem:[%s2175_s11 + $0x28] sm:$0xff] %v1279_v62  ;;  %v1245_v33 = vmax.f32 %v1180_v0, 0.0 }
 0x48d   : > { %v1277_v59 = vmul.f32 %v2170_v39, %v1244_v2  ;;  %v1223_v3 = vpop.f32.mrf.mxu2 }
 0x48e   : > { %v1278_v1 = vmul.f32 %v2173_v44, %v1245_v33  ;;  %v1224_v4 = vadd.f32 %v1223_v3, %v1066_v58 }
 0x48f   : > { %1301 = vst [vmem:[%s2175_s11 + $0x18] sm:$0xff] %v1277_v59 }
 0x490   : > { %1302 = vst [vmem:[%s2175_s11 + $0x20] sm:$0xff] %v1278_v1  ;;  %v1249_v5 = vmax.f32 %v1224_v4, 0.0  ;;  %v1141_v6 = vpop.f32.mrf.mxu0  ;;  %v1091_v4 = vpop.permute.xlu0 %1090 }
 0x491   : > { %v1142_v7 = vadd.f32 %v1141_v6, %v1066_v58  ;;  %v1182_v9 = vpop.f32.mrf.mxu1 }
 0x492   : > { %v1282_v10 = vmul.f32 %v2168_v32, %v1249_v5  ;;  %v1183_v12 = vadd.f32 %v1182_v9, %v1066_v58 }
 0x493   : > { %v1247_v13 = vmax.f32 %v1142_v7, 0.0 }
 0x494   : > { %1306 = vst [vmem:[%s2175_s11 + $0x40] sm:$0xff] %v1282_v10  ;;  %v1248_v14 = vmax.f32 %v1183_v12, 0.0 }
 0x495   : > { %v1280_v16 = vmul.f32 %v2170_v39, %v1247_v13  ;;  %v1226_v17 = vpop.f32.mrf.mxu2 }
 0x496   : > { %v1281_v18 = vmul.f32 %v2173_v44, %v1248_v14  ;;  %v1227_v19 = vadd.f32 %v1226_v17, %v1071_v15 }
 0x497   : > { %1304 = vst [vmem:[%s2175_s11 + $0x30] sm:$0xff] %v1280_v16 }
 0x498   : > { %1305 = vst [vmem:[%s2175_s11 + $0x38] sm:$0xff] %v1281_v18  ;;  %v1252_v20 = vmax.f32 %v1227_v19, 0.0  ;;  %v1144_v21 = vpop.f32.mrf.mxu0 }
 0x499   : > { %v1145_v22 = vadd.f32 %v1144_v21, %v1071_v15  ;;  %v1185_v23 = vpop.f32.mrf.mxu1 }
 0x49a   : > { %v1285_v24 = vmul.f32 %v2168_v32, %v1252_v20  ;;  %v1186_v28 = vadd.f32 %v1185_v23, %v1071_v15 }
 0x49b   : > { %v1250_v29 = vmax.f32 %v1145_v22, 0.0 }
 0x49c   : > { %1309 = vst [vmem:[%s2175_s11 + $0x58] sm:$0xff] %v1285_v24  ;;  %v1251_v30 = vmax.f32 %v1186_v28, 0.0 }
 0x49d   : > { %v1283_v43 = vmul.f32 %v2170_v39, %v1250_v29  ;;  %v1229_v31 = vpop.f32.mrf.mxu2 }
 0x49e   : > { %v1284_v25 = vmul.f32 %v2173_v44, %v1251_v30  ;;  %v1230_v8 = vadd.f32 %v1229_v31, %v1076_v57 }
 0x49f   : > { %1307 = vst [vmem:[%s2175_s11 + $0x48] sm:$0xff] %v1283_v43 }
 0x4a0   : > { %1308 = vst [vmem:[%s2175_s11 + $0x50] sm:$0xff] %v1284_v25  ;;  %v1255_v61 = vmax.f32 %v1230_v8, 0.0  ;;  %v1147_v63 = vpop.f32.mrf.mxu0 }
 0x4a1   : > { %v1148_v11 = vadd.f32 %v1147_v63, %v1076_v57  ;;  %v1188_v26 = vpop.f32.mrf.mxu1 }
 0x4a2   : > { %v1288_v27 = vmul.f32 %v2168_v32, %v1255_v61  ;;  %v1189_v36 = vadd.f32 %v1188_v26, %v1076_v57 }
 0x4a3   : > { %v1253_v53 = vmax.f32 %v1148_v11, 0.0 }
 0x4a4   : > { %1312 = vst [vmem:[%s2175_s11 + $0x70] sm:$0xff] %v1288_v27  ;;  %v1254_v47 = vmax.f32 %v1189_v36, 0.0 }
 0x4a5   : > { %v1286_v35 = vmul.f32 %v2170_v39, %v1253_v53  ;;  %v1232_v37 = vpop.f32.mrf.mxu2 }
 0x4a6   : > { %v1287_v38 = vmul.f32 %v2173_v44, %v1254_v47  ;;  %v1233_v40 = vadd.f32 %v1232_v37, %v1081_v34 }
 0x4a7   : > { %1310 = vst [vmem:[%s2175_s11 + $0x60] sm:$0xff] %v1286_v35 }
 0x4a8   : > { %1311 = vst [vmem:[%s2175_s11 + $0x68] sm:$0xff] %v1287_v38  ;;  %v1258_v41 = vmax.f32 %v1233_v40, 0.0  ;;  %v1150_v42 = vpop.f32.mrf.mxu0 }
 0x4a9   : > { %v1151_v45 = vadd.f32 %v1150_v42, %v1081_v34  ;;  %v1191_v46 = vpop.f32.mrf.mxu1 }
 0x4aa   : > { %v1291_v48 = vmul.f32 %v2168_v32, %v1258_v41  ;;  %v1192_v49 = vadd.f32 %v1191_v46, %v1081_v34 }
 0x4ab   : > { %v1256_v50 = vmax.f32 %v1151_v45, 0.0 }
 0x4ac   : > { %1315 = vst [vmem:[%s2175_s11 + $0x88] sm:$0xff] %v1291_v48  ;;  %v1257_v51 = vmax.f32 %v1192_v49, 0.0 }
 0x4ad   : > { %v1289_v54 = vmul.f32 %v2170_v39, %v1256_v50  ;;  %v1235_v55 = vpop.f32.mrf.mxu2 }
 0x4ae   : > { %v1290_v56 = vmul.f32 %v2173_v44, %v1257_v51  ;;  %v1236_v60 = vadd.f32 %v1235_v55, %v1086_v52 }
 0x4af   : > { %1313 = vst [vmem:[%s2175_s11 + $0x78] sm:$0xff] %v1289_v54 }
 0x4b0   : > { %1314 = vst [vmem:[%s2175_s11 + $0x80] sm:$0xff] %v1290_v56  ;;  %v1261_v62 = vmax.f32 %v1236_v60, 0.0  ;;  %v1153_v0 = vpop.f32.mrf.mxu0 }
 0x4b1   : > { %v1154_v2 = vadd.f32 %v1153_v0, %v1086_v52  ;;  %v1194_v33 = vpop.f32.mrf.mxu1 }
 0x4b2   : > { %v1294_v58 = vmul.f32 %v2168_v32, %v1261_v62  ;;  %v1195_v59 = vadd.f32 %v1194_v33, %v1086_v52 }
 0x4b3   : > { %v1259_v3 = vmax.f32 %v1154_v2, 0.0 }
 0x4b4   : > { %1318 = vst [vmem:[%s2175_s11 + $0xa0] sm:$0xff] %v1294_v58  ;;  %v1260_v1 = vmax.f32 %v1195_v59, 0.0 }
 0x4b5   : > { %v1292_v5 = vmul.f32 %v2170_v39, %v1259_v3  ;;  %v1238_v6 = vpop.f32.mrf.mxu2 }
 0x4b6   : > { %v1293_v7 = vmul.f32 %v2173_v44, %v1260_v1  ;;  %v1239_v9 = vadd.f32 %v1238_v6, %v1091_v4 }
 0x4b7   : > { %1316 = vst [vmem:[%s2175_s11 + $0x90] sm:$0xff] %v1292_v5 }
 0x4b8   : > { %1317 = vst [vmem:[%s2175_s11 + $0x98] sm:$0xff] %v1293_v7  ;;  %v1264_v10 = vmax.f32 %v1239_v9, 0.0  ;;  %v1156_v12 = vpop.f32.mrf.mxu0 }
 0x4b9   : > { %v1157_v13 = vadd.f32 %v1156_v12, %v1091_v4  ;;  %v1197_v14 = vpop.f32.mrf.mxu1 }
 0x4ba   : > { %v1297_v15 = vmul.f32 %v2168_v32, %v1264_v10  ;;  %v1198_v16 = vadd.f32 %v1197_v14, %v1091_v4 }
 0x4bb   : > { %v1262_v17 = vmax.f32 %v1157_v13, 0.0 }
 0x4bc   : > { %1321 = vst [vmem:[%s2175_s11 + $0xb8] sm:$0xff] %v1297_v15  ;;  %v1263_v18 = vmax.f32 %v1198_v16, 0.0 }
 0x4bd   : > { %v1295_v19 = vmul.f32 %v2170_v39, %v1262_v17 }
 0x4be   : > { %v1296_v20 = vmul.f32 %v2173_v44, %v1263_v18 }
 0x4bf   : > { %1319 = vst [vmem:[%s2175_s11 + $0xa8] sm:$0xff] %v1295_v19 }
 0x4c0   : > { %1320 = vst [vmem:[%s2175_s11 + $0xb0] sm:$0xff] %v1296_v20 }
 0x4c1   : > { %1669 = shalt.err (!%p1666_p3)
}
 0x4c2   : > { %s1711_s28 = smov 384   ;;  %s1712_s11 = smov 24  }
 0x4c3   : > { %1461 = dma.vmem_to_hbm [thread:$0]  (%p1806_p5), %s1336_s17, 3072, %s1338_s26, %s1323_s27, %s1711_s28, %s1711_s28, %s1712_s11  }
 0x4c4 PF: > { %p1467_p4 = scmp.ge.s32.totalorder %s1704_s16, 2  ;;  %s1352_s30 = sand.u32 1, %s1692_s13  }
 0x4c5   : > { %s1353_s18 = scalar_lea.sflag [#allocation3], %s1352_s30 }
 0x4c6   : > { %p1464_p7 = pnand %p1467_p4, %p1810_p6 }
 0x4c8   : > { %p1465_p8 = pneg %p1464_p7 }
 0x4ca   : > { %1687 = dma.done.wait (%p1465_p8), %s1353_s18, 3072  }
 0x4cb   : > { %1689 = vsyncadd (%p1465_p8), %s1353_s18, 4294964224  ;;  %p20_p9 = scmp.ge.s32.totalorder %s1793_s19, 4   ;;  %s2271_s13 = smov %s1696_s14 }
 0x4cc   : > { %s2272_s14 = smov %s1700_s15  ;;  %s2273_s15 = smov %s1804_s22 }
 0x4cd   : > { %s2274_s16 = smov %s1793_s19  ;;  %22 = sbr.rel (!%p20_p9) target bundleno = 3 (0x3), region = 98 }
 0x4d2   :  { %1359 = vsyncpa [#allocation3], 1 }
 0x4d3   :  { %1361 = vsyncpa [#allocation3 + $0x1], 1 }

</bundles_post_ra>
